<compile_context>
chip_gen: v7x
topology: tpu7x:2x2x1
jax: 0.10.0
libtpu: 0.0.40
codegen_flags: <defaults>
</compile_context>

<pallas_src>
import functools

import jax
import jax.numpy as jnp
from jax.experimental import pallas as pl
from jax.experimental.pallas import tpu as pltpu

# Compat shim: newer JAX exposes pltpu.CompilerParams, older releases TPUCompilerParams.
_CompilerParams = getattr(pltpu, "CompilerParams", None) or getattr(pltpu, "TPUCompilerParams")

_MASK_VALUE = -3.0e38   # masked logits sit far below any running max -> exp underflows to exactly 0
_M_INIT = -1.0e30       # finite online-softmax running-max init (no inf/NaN in the corrections)


def _round_up(x, m):
    return ((x + m - 1) // m) * m


def _pick_vmem_limit():
    """Generation-aware scoped-VMEM budget (best effort; safe 48 MiB fallback)."""
    cap = 64 * 1024 * 1024
    try:
        cap = int(pltpu.get_tpu_info().vmem_capacity_bytes) or cap
    except Exception:
        pass
    # ~75% of per-core physical VMEM: ~48 MiB on v7x (64 MiB), up to 96 MiB on v5e/v6e (128 MiB).
    return int(min(max(cap * 3 // 4, 32 * 1024 * 1024), 96 * 1024 * 1024))


def _choose_tile(n, vmem_limit):
    # With src-tiling the per-step footprint is ~ tile^2 * (1 B adjacency + a few f32 score/exp
    # blocks) plus small (tile, F) feat/accumulator blocks, so big tiles are safe.
    if n >= 512 and vmem_limit >= 96 * 1024 * 1024:
        return 512          # ~85% of HBM roofline on v6e per measured tiling sweeps
    if n >= 256:
        return 256
    return _round_up(max(n, 8), 8)


def _project_kernel(x_ref, w_ref, al_ref, ar_ref, feat_ref, el_ref, er_ref,
                    *, num_heads, out_feats):
    """Fused projection + attention-logit precompute for one tile of node rows.

    y       = x @ [W_0 | W_1 | ...]      one wide bf16 MXU matmul
    feat[h] = y[:, h]                    bf16, lane-dense per head
    el[h]   = attn_l[h] . y[:, h]^T      (1, tile) src-side logits (hoisted out of Kernel B)
    er[h]   = sum_f y[:, h] * attn_r[h]  (tile, 1) dst-side logits
    """
    y = jnp.dot(x_ref[...], w_ref[...], preferred_element_type=jnp.float32)  # (tile, H*F_out) f32
    for h in range(num_heads):                                               # static unroll, H<=2
        yh = y[:, h * out_feats:(h + 1) * out_feats]                         # (tile, F_out) f32
        feat_ref[h] = yh.astype(jnp.bfloat16)
        el_ref[h] = jax.lax.dot_general(al_ref[h], yh, (((1,), (1,)), ((), ())),
                                        preferred_element_type=jnp.float32)  # (1, tile)
        er_ref[h] = jnp.sum(yh * ar_ref[h], axis=-1, keepdims=True)          # (tile, 1)


def _attn_aggregate_kernel(blk_ref, adjt_ref, feat_ref, el_ref, er_ref, b_ref, o_ref,
                           m_scr, l_scr, acc_scr,
                           *, num_heads, negative_slope, apply_elu):
    i = pl.program_id(0)          # dst-row tile ("parallel")
    j = pl.program_id(1)          # src-row tile (online-softmax reduction, "arbitrary")

    @pl.when(j == 0)
    def _init():
        m_scr[...] = jnp.full_like(m_scr, _M_INIT)
        l_scr[...] = jnp.zeros_like(l_scr)
        acc_scr[...] = jnp.zeros_like(acc_scr)

    @pl.when(blk_ref[i, j] != 0)          # skip blocks with no edges (sparse graphs)
    def _compute():
        mask = adjt_ref[...] != 0         # int8 compare; no f32 copy of the adjacency tile
        for h in range(num_heads):        # static unroll (H <= 2 here); adjt block shared by heads
            s = er_ref[h] + el_ref[h]     # (tile_dst, 1) + (1, tile_src) -> (tile_dst, tile_src)
            s = jnp.where(s > 0, s, negative_slope * s)      # LeakyReLU
            s = jnp.where(mask, s, _MASK_VALUE)              # masked -> exp underflows to 0
            m_prev = m_scr[h]                                # (tile_dst, 1)
            m_new = jnp.maximum(m_prev, jnp.max(s, axis=-1, keepdims=True))
            a = jnp.exp(m_prev - m_new)
            # TODO(synk): on v6e/v7x a bf16 exp here would ~double EUP throughput (kept f32).
            p = jnp.exp(s - m_new)                           # masked entries are exactly 0
            l_scr[h] = a * l_scr[h] + jnp.sum(p, axis=-1, keepdims=True)
            acc_scr[h] = a * acc_scr[h] + jnp.dot(
                p.astype(jnp.bfloat16), feat_ref[h], preferred_element_type=jnp.float32)
            m_scr[h] = m_new

    @pl.when(j == pl.num_programs(1) - 1)
    def _finalize():
        # Zero in-degree / padded dst rows: l == 0 -> clamp keeps the row all-zero (bias-only).
        inv = pl.reciprocal(jnp.maximum(l_scr[...], 1e-20), approx=True)   # (H, tile, 1)
        rst = acc_scr[...] * inv + b_ref[...]                              # (H, tile, F_out)
        if apply_elu:
            rst = jnp.where(rst > 0, rst, jnp.expm1(rst))                  # ELU (expm1: accurate)
        mean = rst[0]
        for h in range(1, num_heads):
            mean = mean + rst[h]
        o_ref[...] = (mean * (1.0 / num_heads)).astype(o_ref.dtype)        # torch.mean over heads


def gat_conv_layer(x_pad, adjt_pad, block_mask, params, *, num_heads, out_feats,
                   negative_slope, apply_elu, tile, out_dtype, vmem_limit):
    n_pad, f_in = x_pad.shape
    n_tiles = n_pad // tile

    # Kernel A: fused per-head projection + el/er precompute, tiled over node rows.
    feat, el, er = pl.pallas_call(
        functools.partial(_project_kernel, num_heads=num_heads, out_feats=out_feats),
        out_shape=(jax.ShapeDtypeStruct((num_heads, n_pad, out_feats), jnp.bfloat16),
                   jax.ShapeDtypeStruct((num_heads, 1, n_pad), jnp.float32),
                   jax.ShapeDtypeStruct((num_heads, n_pad, 1), jnp.float32)),
        grid=(n_tiles,),
        in_specs=[pl.BlockSpec((tile, f_in), lambda i: (i, 0)),
                  pl.BlockSpec((f_in, num_heads * out_feats), lambda i: (0, 0)),
                  pl.BlockSpec((num_heads, 1, out_feats), lambda i: (0, 0, 0)),
                  pl.BlockSpec((num_heads, 1, out_feats), lambda i: (0, 0, 0))],
        out_specs=[pl.BlockSpec((num_heads, tile, out_feats), lambda i: (0, i, 0)),
                   pl.BlockSpec((num_heads, 1, tile), lambda i: (0, 0, i)),
                   pl.BlockSpec((num_heads, tile, 1), lambda i: (0, i, 0))],
        compiler_params=_CompilerParams(
            dimension_semantics=("parallel",),
            vmem_limit_bytes=vmem_limit),
    )(x_pad, params["w_flat"], params["attn_l"], params["attn_r"])

    # Kernel B: flash-style masked edge-softmax + aggregation over (dst-tile, src-tile) blocks.
    # The per-block "has edges" bitmap is scalar-prefetched so empty blocks skip all compute.
    # TODO(synk): pipeline_mode=pl.Buffered(3) on the adjacency spec and a 1-bit-packed adjacency
    # (biggest win on v5e's HBM) are further possible reductions of the N^2 stream; not applied.
    grid_spec = pltpu.PrefetchScalarGridSpec(
        num_scalar_prefetch=1,
        grid=(n_tiles, n_tiles),
        in_specs=[pl.BlockSpec((tile, tile), lambda i, j, bm: (i, j)),              # adj^T block
                  pl.BlockSpec((num_heads, tile, out_feats), lambda i, j, bm: (0, j, 0)),  # feat
                  pl.BlockSpec((num_heads, 1, tile), lambda i, j, bm: (0, 0, j)),   # el (src)
                  pl.BlockSpec((num_heads, tile, 1), lambda i, j, bm: (0, i, 0)),   # er (dst)
                  pl.BlockSpec((num_heads, 1, out_feats), lambda i, j, bm: (0, 0, 0))],  # bias
        out_specs=pl.BlockSpec((tile, out_feats), lambda i, j, bm: (i, 0)),
        scratch_shapes=[pltpu.VMEM((num_heads, tile, 1), jnp.float32),      # running max
                        pltpu.VMEM((num_heads, tile, 1), jnp.float32),      # running denom
                        pltpu.VMEM((num_heads, tile, out_feats), jnp.float32)])  # running acc

    out = pl.pallas_call(
        functools.partial(_attn_aggregate_kernel, num_heads=num_heads,
                          negative_slope=negative_slope, apply_elu=apply_elu),
        out_shape=jax.ShapeDtypeStruct((n_pad, out_feats), out_dtype),
        grid_spec=grid_spec,
        compiler_params=_CompilerParams(
            dimension_semantics=("parallel", "arbitrary"),
            vmem_limit_bytes=vmem_limit),
    )(block_mask, adjt_pad, feat, el, er, params["bias"])
    return out


class GATPallas:
    """Mirrors GAT(in_feats, hidden_features_size, attn_num_heads, ...) in eval mode.

    Single node type / single edge type, so HeteroGraphConv('sum') is the identity wrapper;
    eval mode so feat_drop/attn_drop are no-ops; residuals=False.
    """

    def __init__(self, in_feats, hidden_features_size, attn_num_heads, alphas, key):
        assert attn_num_heads[-1] == 1, "last layer must have only one head"
        self.layer_params = []
        self.layer_cfg = []
        num_layers = len(hidden_features_size)
        f_in = in_feats
        for i in range(num_layers):
            f_out = hidden_features_size[i]
            heads = attn_num_heads[i]
            key, k1, k2, k3 = jax.random.split(key, 4)
            # Deterministic synthetic GATConv parameters: per-head fc weight, attn_l, attn_r, bias.
            w = jax.random.normal(k1, (heads, f_in, f_out), jnp.float32) / jnp.sqrt(
                jnp.float32(f_in))
            attn_l = jax.random.normal(k2, (heads, 1, f_out), jnp.float32) * 0.1
            attn_r = jax.random.normal(k3, (heads, 1, f_out), jnp.float32) * 0.1
            bias = jnp.zeros((heads, 1, f_out), jnp.float32)
            # Heads fused along the MXU column axis: w_flat[:, h*F_out + f] = w[h, :, f].
            w_flat = jnp.transpose(w, (1, 0, 2)).reshape(f_in, heads * f_out).astype(jnp.bfloat16)
            self.layer_params.append(dict(w_flat=w_flat, attn_l=attn_l, attn_r=attn_r, bias=bias))
            self.layer_cfg.append(dict(num_heads=heads, out_feats=f_out,
                                       negative_slope=float(alphas[i]),
                                       apply_elu=(i < num_layers - 1)))
            f_in = f_out

    def forward(self, adj, h):
        # h: Dict[node_type -> (N, F)]; adj: (N_src, N_dst), nonzero where edge u->v exists.
        # TODO(synk): multi-edge-type HeteroGraphConv 'sum' aggregation, residual connections and
        # DGL block (bipartite) sampling are not exercised (single relation, full graph,
        # residuals=False).
        n = adj.shape[0]
        vmem_limit = _pick_vmem_limit()
        tile = _choose_tile(n, vmem_limit)
        n_pad = _round_up(n, tile)
        n_tiles = n_pad // tile
        # Transpose once so edge-softmax reduces over the lane (src) axis; ship as int8 mask and
        # zero-pad to the tile grid (padded src columns are masked out; padded dst rows sliced off).
        adjt = jnp.pad((jnp.transpose(adj) != 0).astype(jnp.int8),
                       ((0, n_pad - n), (0, n_pad - n)))
        # Per-(dst-tile, src-tile) edge-block bitmap, scalar-prefetched into SMEM by Kernel B.
        block_mask = jnp.any((adjt != 0).reshape(n_tiles, tile, n_tiles, tile),
                             axis=(1, 3)).astype(jnp.int32)
        num_layers = len(self.layer_params)
        out = {}
        for k, x in h.items():
            xp = jnp.pad(x.astype(jnp.bfloat16), ((0, n_pad - n), (0, 0)))
            for li, (params, cfg) in enumerate(zip(self.layer_params, self.layer_cfg)):
                out_dtype = jnp.float32 if li == num_layers - 1 else jnp.bfloat16
                xp = gat_conv_layer(xp, adjt, block_mask, params, tile=tile,
                                    out_dtype=out_dtype, vmem_limit=vmem_limit, **cfg)
            out[k] = xp[:n].astype(jnp.float32)
        return out


if __name__ == "__main__":
    N = 8               # number of nodes
    IN_FEATS = 16
    HIDDEN = [32, 16]   # hidden_features_size
    HEADS = [2, 1]      # attn_num_heads (last must be 1)
    ALPHAS = [0.2, 0.2]

    key = jax.random.PRNGKey(0)
    k_adj, k_feat, k_params = jax.random.split(key, 3)

    # Random adjacency with self-loops (no zero in-degree nodes). adj[u, v] = 1 if edge u->v.
    adj = (jax.random.uniform(k_adj, (N, N)) < 0.4).astype(jnp.float32)
    adj = jnp.maximum(adj, jnp.eye(N, dtype=jnp.float32))

    h = {"NODE": jax.random.normal(k_feat, (N, IN_FEATS), jnp.float32)}

    model = GATPallas(IN_FEATS, HIDDEN, HEADS, ALPHAS, k_params)
    out = model.forward(adj, h)

    result = jax.block_until_ready(out["NODE"])
    assert result.shape == (N, HIDDEN[-1])
    assert bool(jnp.all(jnp.isfinite(result)))
    print("KERNEL_OK")
</pallas_src>

<mosaic_0001>
module attributes {stable_mosaic.version = 11 : i64} {
  func.func @_project_kernel(%arg0: i32, %arg1: memref<8x16xbf16, #tpu.memory_space<vmem>>, %arg2: memref<16x64xbf16, #tpu.memory_space<vmem>>, %arg3: memref<2x1x32xf32, #tpu.memory_space<vmem>>, %arg4: memref<2x1x32xf32, #tpu.memory_space<vmem>>, %arg5: memref<2x8x32xbf16, #tpu.memory_space<vmem>>, %arg6: memref<2x1x8xf32, #tpu.memory_space<vmem>>, %arg7: memref<2x8x1xf32, #tpu.memory_space<vmem>>) attributes {dimension_semantics = [#tpu.dimension_semantics<parallel>], iteration_bounds = array<i64: 1>, scalar_prefetch = 0 : i64, scratch_operands = 0 : i64, tpu.core_type = #tpu.core_type<tc>, window_params = [{transform_indices = @transform_0, window_bounds = array<i64: 8, 16>}, {pipeline_mode = #tpu.pipeline_mode<synchronous>, transform_indices = @transform_1, window_bounds = array<i64: 16, 64>}, {pipeline_mode = #tpu.pipeline_mode<synchronous>, transform_indices = @transform_2, window_bounds = array<i64: 2, 1, 32>}, {pipeline_mode = #tpu.pipeline_mode<synchronous>, transform_indices = @transform_3, window_bounds = array<i64: 2, 1, 32>}, {transform_indices = @transform_4, window_bounds = array<i64: 2, 8, 32>}, {transform_indices = @transform_5, window_bounds = array<i64: 2, 1, 8>}, {transform_indices = @transform_6, window_bounds = array<i64: 2, 8, 1>}]} {
    %c0 = arith.constant 0 : index
    %c0_0 = arith.constant 0 : index
    %0 = vector.load %arg1[%c0, %c0_0] : memref<8x16xbf16, #tpu.memory_space<vmem>>, vector<8x16xbf16>
    %c0_1 = arith.constant 0 : index
    %c0_2 = arith.constant 0 : index
    %1 = vector.load %arg2[%c0_1, %c0_2] : memref<16x64xbf16, #tpu.memory_space<vmem>>, vector<16x64xbf16>
    %cst = arith.constant dense<0.000000e+00> : vector<8x64xf32>
    %2 = tpu.matmul %0, %1, %cst {dimension_numbers = #tpu.dot_dimension_numbers<[1], [0], [0], [1], [0, 0, 1, 1], [], []>} : vector<8x16xbf16>, vector<16x64xbf16>, vector<8x64xf32> -> vector<8x64xf32>
    %3 = vector.extract_strided_slice %2 {offsets = [0, 0], sizes = [8, 32], strides = [1, 1]} : vector<8x64xf32> to vector<8x32xf32>
    %4 = arith.truncf %3 : vector<8x32xf32> to vector<8x32xbf16>
    %c0_3 = arith.constant 0 : index
    %c0_4 = arith.constant 0 : index
    %c0_5 = arith.constant 0 : index
    %5 = vector.load %arg5[%c0_3, %c0_4, %c0_5] : memref<2x8x32xbf16, #tpu.memory_space<vmem>>, vector<1x8x32xbf16>
    %6 = vector.shape_cast %5 : vector<1x8x32xbf16> to vector<8x32xbf16>
    %7 = vector.shape_cast %4 : vector<8x32xbf16> to vector<1x8x32xbf16>
    tpu.vector_store %arg5[%c0_3, %c0_4, %c0_5], %7 {strides = array<i32>} : memref<2x8x32xbf16, #tpu.memory_space<vmem>>, vector<1x8x32xbf16>,
    %c0_6 = arith.constant 0 : index
    %c0_7 = arith.constant 0 : index
    %c0_8 = arith.constant 0 : index
    %8 = vector.load %arg3[%c0_6, %c0_7, %c0_8] : memref<2x1x32xf32, #tpu.memory_space<vmem>>, vector<1x1x32xf32>
    %9 = vector.shape_cast %8 : vector<1x1x32xf32> to vector<1x32xf32>
    %cst_9 = arith.constant dense<0.000000e+00> : vector<1x8xf32>
    %10 = tpu.matmul %9, %3, %cst_9 {dimension_numbers = #tpu.dot_dimension_numbers<[1], [1], [0], [0], [0, 0, 1, 0], [], []>} : vector<1x32xf32>, vector<8x32xf32>, vector<1x8xf32> -> vector<1x8xf32>
    %c0_10 = arith.constant 0 : index
    %c0_11 = arith.constant 0 : index
    %c0_12 = arith.constant 0 : index
    %11 = vector.load %arg6[%c0_10, %c0_11, %c0_12] : memref<2x1x8xf32, #tpu.memory_space<vmem>>, vector<1x1x8xf32>
    %12 = vector.shape_cast %11 : vector<1x1x8xf32> to vector<1x8xf32>
    %13 = vector.shape_cast %10 : vector<1x8xf32> to vector<1x1x8xf32>
    tpu.vector_store %arg6[%c0_10, %c0_11, %c0_12], %13 {strides = array<i32>} : memref<2x1x8xf32, #tpu.memory_space<vmem>>, vector<1x1x8xf32>,
    %c0_13 = arith.constant 0 : index
    %c0_14 = arith.constant 0 : index
    %c0_15 = arith.constant 0 : index
    %14 = vector.load %arg4[%c0_13, %c0_14, %c0_15] : memref<2x1x32xf32, #tpu.memory_space<vmem>>, vector<1x1x32xf32>
    %15 = vector.shape_cast %14 : vector<1x1x32xf32> to vector<1x32xf32>
    %16 = vector.broadcast %15 : vector<1x32xf32> to vector<8x32xf32>
    %17 = arith.mulf %3, %16 : vector<8x32xf32>
    %cst_16 = arith.constant dense<0.000000e+00> : vector<8xf32>
    %18 = vector.multi_reduction <add>, %17, %cst_16 [1] : vector<8x32xf32> to vector<8xf32>
    %19 = vector.shape_cast %18 : vector<8xf32> to vector<8x1xf32>
    %c0_17 = arith.constant 0 : index
    %c0_18 = arith.constant 0 : index
    %c0_19 = arith.constant 0 : index
    %20 = vector.load %arg7[%c0_17, %c0_18, %c0_19] : memref<2x8x1xf32, #tpu.memory_space<vmem>>, vector<1x8x1xf32>
    %21 = vector.shape_cast %20 : vector<1x8x1xf32> to vector<8x1xf32>
    %22 = vector.shape_cast %19 : vector<8x1xf32> to vector<1x8x1xf32>
    tpu.vector_store %arg7[%c0_17, %c0_18, %c0_19], %22 {strides = array<i32>} : memref<2x8x1xf32, #tpu.memory_space<vmem>>, vector<1x8x1xf32>,
    %23 = vector.extract_strided_slice %2 {offsets = [0, 32], sizes = [8, 32], strides = [1, 1]} : vector<8x64xf32> to vector<8x32xf32>
    %24 = arith.truncf %23 : vector<8x32xf32> to vector<8x32xbf16>
    %c1 = arith.constant 1 : index
    %c0_20 = arith.constant 0 : index
    %c0_21 = arith.constant 0 : index
    %25 = vector.load %arg5[%c1, %c0_20, %c0_21] : memref<2x8x32xbf16, #tpu.memory_space<vmem>>, vector<1x8x32xbf16>
    %26 = vector.shape_cast %25 : vector<1x8x32xbf16> to vector<8x32xbf16>
    %27 = vector.shape_cast %24 : vector<8x32xbf16> to vector<1x8x32xbf16>
    tpu.vector_store %arg5[%c1, %c0_20, %c0_21], %27 {strides = array<i32>} : memref<2x8x32xbf16, #tpu.memory_space<vmem>>, vector<1x8x32xbf16>,
    %c1_22 = arith.constant 1 : index
    %c0_23 = arith.constant 0 : index
    %c0_24 = arith.constant 0 : index
    %28 = vector.load %arg3[%c1_22, %c0_23, %c0_24] : memref<2x1x32xf32, #tpu.memory_space<vmem>>, vector<1x1x32xf32>
    %29 = vector.shape_cast %28 : vector<1x1x32xf32> to vector<1x32xf32>
    %cst_25 = arith.constant dense<0.000000e+00> : vector<1x8xf32>
    %30 = tpu.matmul %29, %23, %cst_25 {dimension_numbers = #tpu.dot_dimension_numbers<[1], [1], [0], [0], [0, 0, 1, 0], [], []>} : vector<1x32xf32>, vector<8x32xf32>, vector<1x8xf32> -> vector<1x8xf32>
    %c1_26 = arith.constant 1 : index
    %c0_27 = arith.constant 0 : index
    %c0_28 = arith.constant 0 : index
    %31 = vector.load %arg6[%c1_26, %c0_27, %c0_28] : memref<2x1x8xf32, #tpu.memory_space<vmem>>, vector<1x1x8xf32>
    %32 = vector.shape_cast %31 : vector<1x1x8xf32> to vector<1x8xf32>
    %33 = vector.shape_cast %30 : vector<1x8xf32> to vector<1x1x8xf32>
    tpu.vector_store %arg6[%c1_26, %c0_27, %c0_28], %33 {strides = array<i32>} : memref<2x1x8xf32, #tpu.memory_space<vmem>>, vector<1x1x8xf32>,
    %c1_29 = arith.constant 1 : index
    %c0_30 = arith.constant 0 : index
    %c0_31 = arith.constant 0 : index
    %34 = vector.load %arg4[%c1_29, %c0_30, %c0_31] : memref<2x1x32xf32, #tpu.memory_space<vmem>>, vector<1x1x32xf32>
    %35 = vector.shape_cast %34 : vector<1x1x32xf32> to vector<1x32xf32>
    %36 = vector.broadcast %35 : vector<1x32xf32> to vector<8x32xf32>
    %37 = arith.mulf %23, %36 : vector<8x32xf32>
    %cst_32 = arith.constant dense<0.000000e+00> : vector<8xf32>
    %38 = vector.multi_reduction <add>, %37, %cst_32 [1] : vector<8x32xf32> to vector<8xf32>
    %39 = vector.shape_cast %38 : vector<8xf32> to vector<8x1xf32>
    %c1_33 = arith.constant 1 : index
    %c0_34 = arith.constant 0 : index
    %c0_35 = arith.constant 0 : index
    %40 = vector.load %arg7[%c1_33, %c0_34, %c0_35] : memref<2x8x1xf32, #tpu.memory_space<vmem>>, vector<1x8x1xf32>
    %41 = vector.shape_cast %40 : vector<1x8x1xf32> to vector<8x1xf32>
    %42 = vector.shape_cast %39 : vector<8x1xf32> to vector<1x8x1xf32>
    tpu.vector_store %arg7[%c1_33, %c0_34, %c0_35], %42 {strides = array<i32>} : memref<2x8x1xf32, #tpu.memory_space<vmem>>, vector<1x8x1xf32>,
    return
  }
  func.func @transform_0(%arg0: i32) -> (i32, i32) {
    %c0_i32 = arith.constant 0 : i32
    %c0_i32_0 = arith.constant 0 : i32
    return %arg0, %c0_i32 : i32, i32
  }
  func.func @transform_1(%arg0: i32) -> (i32, i32) {
    %c0_i32 = arith.constant 0 : i32
    %c0_i32_0 = arith.constant 0 : i32
    %c0_i32_1 = arith.constant 0 : i32
    return %c0_i32, %c0_i32_0 : i32, i32
  }
  func.func @transform_2(%arg0: i32) -> (i32, i32, i32) {
    %c0_i32 = arith.constant 0 : i32
    %c0_i32_0 = arith.constant 0 : i32
    %c0_i32_1 = arith.constant 0 : i32
    %c0_i32_2 = arith.constant 0 : i32
    return %c0_i32, %c0_i32_0, %c0_i32_1 : i32, i32, i32
  }
  func.func @transform_3(%arg0: i32) -> (i32, i32, i32) {
    %c0_i32 = arith.constant 0 : i32
    %c0_i32_0 = arith.constant 0 : i32
    %c0_i32_1 = arith.constant 0 : i32
    %c0_i32_2 = arith.constant 0 : i32
    return %c0_i32, %c0_i32_0, %c0_i32_1 : i32, i32, i32
  }
  func.func @transform_4(%arg0: i32) -> (i32, i32, i32) {
    %c0_i32 = arith.constant 0 : i32
    %c0_i32_0 = arith.constant 0 : i32
    %c0_i32_1 = arith.constant 0 : i32
    return %c0_i32, %arg0, %c0_i32_0 : i32, i32, i32
  }
  func.func @transform_5(%arg0: i32) -> (i32, i32, i32) {
    %c0_i32 = arith.constant 0 : i32
    %c0_i32_0 = arith.constant 0 : i32
    %c0_i32_1 = arith.constant 0 : i32
    return %c0_i32, %c0_i32_0, %arg0 : i32, i32, i32
  }
  func.func @transform_6(%arg0: i32) -> (i32, i32, i32) {
    %c0_i32 = arith.constant 0 : i32
    %c0_i32_0 = arith.constant 0 : i32
    %c0_i32_1 = arith.constant 0 : i32
    return %c0_i32, %arg0, %c0_i32_0 : i32, i32, i32
  }
}

</mosaic_0001>

<bundles_post_ra>
// kernel: tpu_custom_call.1
= control target key start
LH: loop header
LB: loop body
LE: loop exit
PB: predicated region body
PF: predicated region fallthrough
CT: control target
= control target key end

     0   :  { %12 = vsyncpa [#allocation3], 0  ;;  %s631_s0 = inlined_call_operand.hbm [shape: bf16[8,16], index: 0, kind: input, shape index: {}]   ;;  %s632_s1 = inlined_call_operand.hbm [shape: bf16[16,64], index: 1, kind: input, shape index: {}]   ;;  %s633_s2 = inlined_call_operand.vmem [shape: f32[2,1,32], index: 2, kind: input, shape index: {}]   ;;  %s634_s3 = inlined_call_operand.vmem [shape: f32[2,1,32], index: 3, kind: input, shape index: {}]   ;;  %s635_s4 = inlined_call_operand.hbm [shape: bf16[2,8,32], index: 4, kind: output, shape index: {0}]   ;;  %s636_s5 = inlined_call_operand.hbm [shape: f32[2,1,8], index: 5, kind: output, shape index: {1}]   ;;  %s637_s6 = inlined_call_operand.vmem [shape: f32[2,8,1], index: 6, kind: output, shape index: {2}]  }
   0x1   :  { %13 = vsyncpa [#allocation6], 0 }
   0x2   :  { %14 = vsyncpa [#allocation4], 0 }
   0x3   :  { %15 = vsyncpa [#allocation9], 0  ;;  %s489_s21 = smov [#allocation2]   ;;  %s490_s23 = smov [#allocation5]  }
   0x4   :  { %s22_s22 = sshll.u32 %s489_s21, 4  ;;  %s31_s24 = sshll.u32 %s490_s23, 4  ;;  %s23_s22 = int_to_ptr.vmem [resolvable:$true] %s22_s22  ;;  %s536_s24 = int_to_ptr.vmem [resolvable:$true] %s31_s24 }
   0x5   :  { %s393_s27 = scalar_lea.hbm %s631_s0, 64 }
   0x6   :  { %p394_p0 = scmp.ne.s32.totalorder %s631_s0, %s393_s27  ;;  %p397_p1 = scmp.lt.u32.totalorder %s393_s27, %s631_s0 }
   0x8   :  { %p399_p2 = pnand %p397_p1, %p394_p0 }
   0xa   :  { %402 = shalt.err (!%p399_p2)
}
   0xb   :  { %s403_s8 = scalar_lea.vmem %s23_s22, 64  ;;  %p408_p4 = scmp.lt.s32.totalorder %s23_s22, %s23_s22 }
   0xc   :  { %p404_p3 = scmp.ne.s32.totalorder %s23_s22, %s403_s8  ;;  %p409_p5 = scmp.lt.s32.totalorder %s403_s8, %s403_s8 }
   0xe   :  { %p410_p6 = por %p409_p5, %p408_p4 }
  0x10   :  { %p411_p7 = pnand %p410_p6, %p404_p3 }
  0x12   :  { %414 = shalt.err (!%p411_p7)
}
  0x13   :  { %25 = dma.hbm_to_vmem [thread:$0]  %s631_s0, 64, %s23_s22, [#allocation3]  }
  0x14   :  { %s415_s13 = scalar_lea.hbm %s632_s1, 128 }
  0x15   :  { %p416_p8 = scmp.ne.s32.totalorder %s632_s1, %s415_s13  ;;  %p419_p9 = scmp.lt.u32.totalorder %s415_s13, %s632_s1 }
  0x17   :  { %p421_p10 = pnand %p419_p9, %p416_p8 }
  0x19   :  { %424 = shalt.err (!%p421_p10)
}
  0x1a   :  { %s425_s18 = scalar_lea.vmem %s536_s24, 128  ;;  %p430_p12 = scmp.lt.s32.totalorder %s536_s24, %s536_s24 }
  0x1b   :  { %p426_p11 = scmp.ne.s32.totalorder %s536_s24, %s425_s18  ;;  %p431_p13 = scmp.lt.s32.totalorder %s425_s18, %s425_s18 }
  0x1d   :  { %p432_p0 = por %p431_p13, %p430_p12 }
  0x1f   :  { %p433_p1 = pnand %p432_p0, %p426_p11 }
  0x21   :  { %436 = shalt.err (!%p433_p1)
}
  0x22   :  { %s491_s0 = smov 64   ;;  %s492_s19 = smov 4  }
  0x23   :  { %37 = dma.hbm_to_vmem [thread:$0]  %s632_s1, 128, %s536_s24, [#allocation6], %s491_s0, %s491_s0, %s492_s19  }
  0x24   :  { %481 = dma.done.wait [#allocation3], 64  }
  0x25   :  { %482 = vsyncadd [#allocation3], 4294967232 }
  0x26   :  { %483 = dma.done.wait [#allocation6], 128  }
  0x27   :  { %484 = vsyncadd [#allocation6], 4294967168  ;;  %v493_v0 = vmov 0.0   ;;  %vm494_vm0 = vmmov 0   ;;  %v392_v1 = vld [vmem:[#allocation5] sm:$0xff]   ;;  %vm58_vm1 = vcmask 130048  }
  0x28   :  { %364 = vmatprep.subr.bf16.mxu0 %v493_v0  ;;  %366 = vmatprep.mubr.msk.bf16.mxu0 %vm494_vm0, %v493_v0  ;;  %v49_v2 = vld [vmem:[#allocation2] sm:$0xf]  ;;  %vm106_vm2 = vcmask 261120   ;;  %vm103_vm3 = vcmask 257024   ;;  %s495_s1 = smov 96   ;;  %s496_s26 = smov 32  }
  0x29   :  { %370 = vmatprep.subr.mxu1 %v493_v0  ;;  %372 = vmatprep.mubr.msk.f32.mxu1 %vm494_vm0, %v493_v0  ;;  %v105_v5 = vld [vmem:[%s633_s2] sm:$0x1]  ;;  %v355_v8 = vld [vmem:[%s634_s3 + $0x1] ss:$0 sm:$0xff]  ;;  %vm183_vm4 = vcmask 57344   ;;  %vm196_vm5 = vcmask 7168  }
  0x2a   :  { %365 = vmatpush3.bf16.msra.mxu0 %v392_v1  ;;  %v351_v11 = vld [vmem:[%s633_s2 + $0x1] sm:$0x1]  ;;  %v349_v14 = vld [vmem:[%s634_s3] ss:$0 sm:$0xff]  ;;  %s497_s3 = smov [#allocation8]  }
  0x2b   :  { %s324_s8 = sshll.u32 %s497_s3, 4  ;;  %s325_s8 = int_to_ptr.vmem [resolvable:$true] %s324_s8 }
  0x2c   :  { %s437_s9 = scalar_lea.vmem %s325_s8, 32  ;;  %p442_p3 = scmp.lt.s32.totalorder %s325_s8, %s325_s8 }
  0x2d   :  { %367 = vmatmul.mubr.msk.bf16.vlgmr.msra.gmra.mrb[0].mxu0 %vm58_vm1, %v49_v2  ;;  %p438_p2 = scmp.ne.s32.totalorder %s325_s8, %s437_s9  ;;  %p443_p4 = scmp.lt.s32.totalorder %s437_s9, %s437_s9 }
  0x2f   :  { %p444_p5 = por %p443_p4, %p442_p3 }
  0x31   :  { %p445_p6 = pnand %p444_p5, %p438_p2 }
 0x100   :  { %v96_v3 = vpop.f32.mrb[0].mxu0 }
 0x101   :  { %208 = vrot.lane.b32.xlu0 %v96_v3, %s495_s1  ;;  %v368_v4 = vpop.f32.mrb[1].mxu0  ;;  %371 = vmatpush3.xpose.msk.msra.mxu1 %vm106_vm2, %v96_v3  ;;  %v102_v6 = vpack.c.bf16 %v96_v3, %v96_v3  ;;  %v192_v15 = vmul.f32 %v349_v14, %v96_v3 }
 0x102   :  { %v99_v7 = vpop.f32.mrb[2].mxu0  ;;  %375 = vmatprep.subr.mxu1 %v493_v0 }
 0x103   :  { %v369_v9 = vpop.f32.mrb[3].mxu0  ;;  %104 = vst.msk [vmem:[#allocation7] sm:$0xf] %vm103_vm3, %v102_v6  ;;  %v193_v16 = vsel %vm106_vm2, %v192_v15, 0.0 }
 0x104   :  { %373 = vmatmul.mubr.msk.f32.vlgmr.msra.gmra.mrb[0].mxu1 %vm106_vm2, %v105_v5 }
 0x105   :  { %294 = vrot.lane.b32.xlu0 %v355_v8, %s496_s26  ;;  %377 = vmatprep.mubr.msk.f32.mxu1 %vm494_vm0, %v493_v0 }
 0x173   :  { %v209_v10 = vpop.permute.xlu0 %208 }
 0x174   :  { %376 = vmatpush3.xpose.msk.msra.mxu1 %vm106_vm2, %v209_v10 }
 0x177   :  { %v295_v12 = vpop.permute.xlu0 %294  ;;  %378 = vmatmul.mubr.msk.f32.vlgmr.msra.gmra.mrb[2].mxu1 %vm106_vm2, %v351_v11 }
 0x178   :  { %v297_v13 = vmul.f32 %v295_v12, %v96_v3 }
 0x17a   :  { %299 = vrot.lane.b32.xlu1 %v297_v13, %s495_s1 }
 0x19e   :  { %194 = vadd.xlane.f32.xlu1 %v193_v16 }
 0x1d7   :  { %v179_v17 = vpop.f32.mrb[0].mxu1 }
 0x1d8   :  { %184 = vst.msk [vmem:[#allocation8] sm:$0x1] %vm183_vm4, %v179_v17  ;;  %v374_v18 = vpop.f32.mrb[1].mxu1 }
 0x1ec   :  { %v300_v19 = vpop.permute.xlu1 %299 }
 0x1ed   :  { %v302_v20 = vsel %vm106_vm2, %v300_v19, 0.0 }
 0x1ee   :  { %303 = vadd.xlane.f32.xlu0 %v302_v20 }
 0x204   :  { %201 = vrot.lane.b32.xlu0 %v102_v6, %s495_s1 }
 0x22b   :  { %v195_v21 = vpop.xlane.xlu1 %194 }
 0x22c   :  { %197 = vst.msk [vmem:[%s637_s6] sm:$0xff] %vm196_vm5, %v195_v21 }
 0x24a   :  { %v281_v22 = vpop.f32.mrb[2].mxu1 }
 0x24b   :  { %286 = vst.msk [vmem:[#allocation8 + $0x1] sm:$0x1] %vm183_vm4, %v281_v22  ;;  %v379_v23 = vpop.f32.mrb[3].mxu1 }
 0x24c   :  { %448 = shalt.err (!%p445_p6)
}
 0x24d   :  { %s449_s12 = scalar_lea.hbm %s636_s5, 32 }
 0x24e   :  { %p450_p7 = scmp.ne.s32.totalorder %s636_s5, %s449_s12  ;;  %p453_p8 = scmp.lt.u32.totalorder %s449_s12, %s636_s5 }
 0x250   :  { %p455_p9 = pnand %p453_p8, %p450_p7 }
 0x252   :  { %458 = shalt.err (!%p455_p9)
}
 0x253   :  { %s498_s17 = smov 16   ;;  %s499_s18 = smov 1  }
 0x254   :  { %330 = dma.vmem_to_hbm [thread:$0]  %s325_s8, 32, %s636_s5, [#allocation9], %s498_s17, %s498_s17, %s499_s18  }
 0x255   :  { %s500_s1 = smov [#allocation7]  }
 0x256   :  { %s312_s22 = sshll.u32 %s500_s1, 4  ;;  %s313_s22 = int_to_ptr.vmem [resolvable:$true] %s312_s22 }
 0x257   :  { %s459_s25 = scalar_lea.vmem %s313_s22, 128  ;;  %p464_p11 = scmp.lt.s32.totalorder %s313_s22, %s313_s22 }
 0x258   :  { %p460_p10 = scmp.ne.s32.totalorder %s313_s22, %s459_s25  ;;  %p465_p12 = scmp.lt.s32.totalorder %s459_s25, %s459_s25 }
 0x25a   :  { %p466_p13 = por %p465_p12, %p464_p11 }
 0x25c   :  { %p467_p0 = pnand %p466_p13, %p460_p10 }
 0x27b   :  { %v304_v24 = vpop.xlane.xlu0 %303 }
 0x27c   :  { %356 = vst.msk [vmem:[%s637_s6 + $0x8] sm:$0xff] %vm196_vm5, %v304_v24 }
 0x27f   :  { %v202_v25 = vpop.permute.xlu0 %201 }
 0x280   :  { %205 = vst.msk [vmem:[#allocation7 + $0x4] sm:$0xf] %vm103_vm3, %v202_v25 }
 0x281   :  { %470 = shalt.err (!%p467_p0)
}
 0x282   :  { %s471_s27 = scalar_lea.hbm %s635_s4, 128 }
 0x283   :  { %p472_p1 = scmp.ne.s32.totalorder %s635_s4, %s471_s27  ;;  %p475_p2 = scmp.lt.u32.totalorder %s471_s27, %s635_s4 }
 0x285   :  { %p477_p3 = pnand %p475_p2, %p472_p1 }
 0x287   :  { %480 = shalt.err (!%p477_p3)
}
 0x288   :  { %318 = dma.vmem_to_hbm [thread:$0]  %s313_s22, 128, %s635_s4, [#allocation4], %s491_s0, %s491_s0, %s492_s19  }
 0x289   :  { %485 = dma.done.wait [#allocation4], 128  }
 0x28a   :  { %486 = vsyncadd [#allocation4], 4294967168 }
 0x28b   :  { %487 = dma.done.wait [#allocation9], 32  }
 0x28c   :  { %488 = vsyncadd [#allocation9], 4294967264 }
 0x28d   :  { %341 = vsyncpa [#allocation3], 1 }
 0x28e   :  { %342 = vsyncpa [#allocation6], 1 }
 0x28f   :  { %343 = vsyncpa [#allocation4], 1 }
 0x290   :  { %344 = vsyncpa [#allocation9], 1 }

</bundles_post_ra>
